<compile_context>
chip_gen: v6e
topology: v6e:2x2x1
jax: 0.10.0
libtpu: 0.0.40
codegen_flags: <defaults>
</compile_context>

<pallas_src>
import functools

import jax
import jax.numpy as jnp
from jax.experimental import pallas as pl
from jax.experimental.pallas import tpu as pltpu


def _round_up(x: int, m: int) -> int:
    return ((x + m - 1) // m) * m


def _vmem_capacity_bytes() -> int:
    """Physical VMEM per TensorCore (64 MiB on v7x, 128 MiB on v5e/v6e)."""
    try:
        info = pltpu.get_tpu_info()
        for name in ("vmem_capacity_bytes", "vmem_size_bytes", "vmem_bytes"):
            v = getattr(info, name, None)
            if v:
                return int(v)
    except Exception:
        pass
    return 64 * 1024 * 1024  # conservative default (v7x per-TC)


def _select_tiles(R, E_pad, H_pad, in_sz, out_sz, budget, tr_req):
    """Pick (TR, HK) from a VMEM-footprint computation.

    TR (row tile) is the primary knob: w1/w2 are re-streamed from HBM once per
    row tile, so the weight-stream intensity ~ TR.  HK (hidden chunk) then
    grows into the leftover budget; HK == H_pad => weights fully resident and
    DMAed exactly once for the whole call.
    """
    # Sublane packing: f32 -> 8 rows/vreg, bf16 -> 16, int8/fp8 -> 32.
    row_mult = 8 if in_sz >= 4 else (16 if in_sz == 2 else 32)

    def footprint(tr, hk):
        return (2 * tr * E_pad * in_sz          # x tile, double-buffered
                + 2 * tr * E_pad * out_sz       # out tile, double-buffered
                + tr * E_pad * 4                # f32 accumulator
                + 4 * E_pad * hk * in_sz        # w1 + w2 chunks, double-buffered
                + 2 * (H_pad + E_pad) * in_sz)  # resident biases

    # HK candidates: multiples of 128 that divide H_pad exactly (largest first),
    # so the once-padded weights never need re-padding inside the call.
    m = H_pad // 128
    hk_cands = sorted({d * 128 for d in range(1, m + 1) if m % d == 0},
                      reverse=True)
    hk_floor = max([h for h in hk_cands if h <= 512], default=hk_cands[-1])

    # Upper bound on a useful TR: cover R, but keep >= 2 row tiles when R allows
    # so the "parallel" row axis can shard across both v7x TensorCores.
    tr_cap = _round_up(R, row_mult)
    if R >= 2 * row_mult:
        tr_cap = min(tr_cap, _round_up(-(-R // 2), row_mult))
    tr_cap = min(tr_cap, 4096)
    if tr_req is not None:
        tr_cap = min(tr_cap, max(row_mult, _round_up(int(tr_req), row_mult)))

    tr = tr_cap
    while tr > row_mult and footprint(tr, hk_floor) > budget:
        tr = max(row_mult, _round_up(tr // 2, row_mult))

    hk = next((h for h in hk_cands if footprint(tr, h) <= budget),
              hk_cands[-1])
    return tr, hk


def _ffn_kernel(x_ref, w1_ref, b1_ref, w2_ref, b2_ref, o_ref, acc_ref):
    # x_ref:  (TR, E_pad)    w1_ref: (E_pad, HK)   b1_ref: (1, H_pad) resident
    # w2_ref: (HK, E_pad)    b2_ref: (1, E_pad)    o_ref:  (TR, E_pad)
    # acc_ref: VMEM (TR, E_pad) f32, resident across the hidden-chunk axis.
    k = pl.program_id(1)
    hk = w1_ref.shape[1]

    @pl.when(k == 0)
    def _():
        acc_ref[...] = jnp.zeros_like(acc_ref)

    # b1 is resident; slice the current hidden chunk out of it.
    if hk == b1_ref.shape[1]:            # weights-resident fast path (HK == H_pad)
        b1_chunk = b1_ref[...]
    else:
        off = pl.multiple_of(k * hk, hk)
        b1_chunk = b1_ref[:, pl.ds(off, hk)]

    # fc1 chunk + ReLU (exact per hidden unit -> chunking over H is exact).
    h = jnp.dot(x_ref[...], w1_ref[...], preferred_element_type=jnp.float32)
    h = jnp.maximum(h + b1_chunk, 0.0)

    # fc2 partial: accumulate this hidden chunk's contribution in f32.
    acc_ref[...] += jnp.dot(
        h.astype(w2_ref.dtype), w2_ref[...], preferred_element_type=jnp.float32
    )

    @pl.when(k == pl.num_programs(1) - 1)
    def _():
        o_ref[...] = (acc_ref[...] + b2_ref[...]).astype(o_ref.dtype)


def pad_ffn_params(w1, b1, w2, b2):
    """Zero-pad params to lane-aligned (multiple-of-128) shapes. Call ONCE at init."""
    E, H = w1.shape
    E_pad, H_pad = _round_up(E, 128), _round_up(H, 128)
    w1_p = jnp.pad(w1, ((0, E_pad - E), (0, H_pad - H)))
    b1_p = jnp.pad(b1.reshape(1, -1), ((0, 0), (0, H_pad - H)))
    w2_p = jnp.pad(w2, ((0, H_pad - H), (0, E_pad - E)))
    b2_p = jnp.pad(b2.reshape(1, -1), ((0, 0), (0, E_pad - E)))
    return w1_p, b1_p, w2_p, b2_p


@functools.partial(jax.jit, static_argnames=("tr",))
def feed_forward(x, w1_p, b1_p, w2_p, b2_p, *, tr=None):
    """x: [..., E]; padded params from pad_ffn_params. tr: optional row-tile cap."""
    orig_shape = x.shape
    E = orig_shape[-1]
    E_pad, H_pad = w1_p.shape
    x2d = x.reshape(-1, E)
    R = x2d.shape[0]

    # Pad only the feature (contraction) dim of x; rows are handled by Pallas
    # masking of the partial last row tile (no full HBM copy for ragged R).
    if E_pad != E:
        x2d = jnp.pad(x2d, ((0, 0), (0, E_pad - E)))

    in_sz = jnp.dtype(x.dtype).itemsize
    out_sz = in_sz
    w_sz = jnp.dtype(w1_p.dtype).itemsize

    cap = _vmem_capacity_bytes()
    budget = min((cap * 3) // 4, 96 * 1024 * 1024)          # tile-buffer budget
    vmem_limit = min((cap * 9) // 10, 100 * 1024 * 1024)    # compiler scoped limit

    TR, HK = _select_tiles(R, E_pad, H_pad, in_sz, out_sz, budget, tr)
    grid = (pl.cdiv(R, TR), H_pad // HK)

    cost = pl.CostEstimate(
        flops=4 * R * H_pad * E_pad,
        transcendentals=0,
        bytes_accessed=(
            R * E_pad * (in_sz + out_sz)                 # x read + out write
            + 2 * E_pad * H_pad * w_sz * grid[0]         # weights, re-streamed per row tile
            + (H_pad + E_pad) * w_sz                     # biases
        ),
    )

    out = pl.pallas_call(
        _ffn_kernel,
        out_shape=jax.ShapeDtypeStruct((R, E_pad), x.dtype),
        grid_spec=pltpu.PrefetchScalarGridSpec(
            num_scalar_prefetch=0,
            grid=grid,
            in_specs=[
                pl.BlockSpec((TR, E_pad), lambda i, k: (i, 0)),   # x row tile
                pl.BlockSpec((E_pad, HK), lambda i, k: (0, k)),   # w1 hidden chunk
                pl.BlockSpec((1, H_pad), lambda i, k: (0, 0)),    # b1 (resident)
                pl.BlockSpec((HK, E_pad), lambda i, k: (k, 0)),   # w2 hidden chunk
                pl.BlockSpec((1, E_pad), lambda i, k: (0, 0)),    # b2 (resident)
            ],
            out_specs=pl.BlockSpec((TR, E_pad), lambda i, k: (i, 0)),
            scratch_shapes=[pltpu.VMEM((TR, E_pad), jnp.float32)],
        ),
        compiler_params=pltpu.CompilerParams(
            # rows: independent -> parallel (megacore on v7x); hidden chunks:
            # reduction -> arbitrary, last in the grid.
            dimension_semantics=("parallel", "arbitrary"),
            vmem_limit_bytes=vmem_limit,
        ),
        cost_estimate=cost,
    )(x2d, w1_p, b1_p, w2_p, b2_p)

    return out[:, :E].reshape(orig_shape)


def init_params(key, embed_dim, hidden_dim, dtype=jnp.float32):
    """Deterministic init mimicking nn.Linear defaults (uniform +/- 1/sqrt(fan_in))."""
    k1, k2, k3, k4 = jax.random.split(key, 4)
    bound1 = 1.0 / (embed_dim ** 0.5)
    bound2 = 1.0 / (hidden_dim ** 0.5)
    # stored as [in_dim, out_dim] (transpose of torch's [out, in])
    w1 = jax.random.uniform(k1, (embed_dim, hidden_dim), dtype, -bound1, bound1)
    b1 = jax.random.uniform(k2, (hidden_dim,), dtype, -bound1, bound1)
    w2 = jax.random.uniform(k3, (hidden_dim, embed_dim), dtype, -bound2, bound2)
    b2 = jax.random.uniform(k4, (embed_dim,), dtype, -bound2, bound2)
    return w1, b1, w2, b2


if __name__ == "__main__":
    # config = {'embed_dim': 32, 'hidden_dim': 64}
    embed_dim, hidden_dim = 32, 64
    batch, seq = 2, 8

    key = jax.random.PRNGKey(0)
    kx, kp = jax.random.split(key)
    x = jax.random.normal(kx, (batch, seq, embed_dim), jnp.float32)
    w1, b1, w2, b2 = init_params(kp, embed_dim, hidden_dim)

    # Pad weights/biases ONCE (outside the per-call path).
    w1_p, b1_p, w2_p, b2_p = pad_ffn_params(w1, b1, w2, b2)

    y = feed_forward(x, w1_p, b1_p, w2_p, b2_p)
    y = jax.block_until_ready(y)

    # reference check in plain JAX
    ref = jnp.maximum(x @ w1 + b1, 0.0) @ w2 + b2
    assert y.shape == x.shape
    assert jnp.allclose(y, ref, atol=1e-5, rtol=1e-5)

    print("KERNEL_OK")
</pallas_src>

<mosaic_0001>
module attributes {stable_mosaic.version = 11 : i64} {
  func.func @_ffn_kernel(%arg0: i32, %arg1: i32, %arg2: memref<8x128xf32, #tpu.memory_space<vmem>>, %arg3: memref<128x128xf32, #tpu.memory_space<vmem>>, %arg4: memref<1x128xf32, #tpu.memory_space<vmem>>, %arg5: memref<128x128xf32, #tpu.memory_space<vmem>>, %arg6: memref<1x128xf32, #tpu.memory_space<vmem>>, %arg7: memref<8x128xf32, #tpu.memory_space<vmem>>, %arg8: memref<8x128xf32, #tpu.memory_space<vmem>>) attributes {dimension_semantics = [#tpu.dimension_semantics<parallel>, #tpu.dimension_semantics<arbitrary>], iteration_bounds = array<i64: 2, 1>, scalar_prefetch = 0 : i64, scratch_operands = 1 : i64, tpu.core_type = #tpu.core_type<tc>, window_params = [{transform_indices = @transform_0, window_bounds = array<i64: 8, 128>}, {transform_indices = @transform_1, window_bounds = array<i64: 128, 128>}, {pipeline_mode = #tpu.pipeline_mode<synchronous>, transform_indices = @transform_2, window_bounds = array<i64: 1, 128>}, {transform_indices = @transform_3, window_bounds = array<i64: 128, 128>}, {pipeline_mode = #tpu.pipeline_mode<synchronous>, transform_indices = @transform_4, window_bounds = array<i64: 1, 128>}, {transform_indices = @transform_5, window_bounds = array<i64: 8, 128>}]} {
    %c0_i32 = arith.constant 0 : i32
    %0 = arith.cmpi eq, %arg1, %c0_i32 : i32
    %1 = arith.extui %0 : i1 to i32
    %c0_i32_0 = arith.constant 0 : i32
    %2 = arith.cmpi ne, %1, %c0_i32_0 : i32
    scf.if %2 {
      %cst_16 = arith.constant 0.000000e+00 : f32
      %19 = vector.broadcast %cst_16 : f32 to vector<8x128xf32>
      %c0_17 = arith.constant 0 : index
      %c0_18 = arith.constant 0 : index
      %20 = vector.load %arg8[%c0_17, %c0_18] : memref<8x128xf32, #tpu.memory_space<vmem>>, vector<8x128xf32>
      tpu.vector_store %arg8[%c0_17, %c0_18], %19 {strides = array<i32>} : memref<8x128xf32, #tpu.memory_space<vmem>>, vector<8x128xf32>,
    } else {
    }
    %c0 = arith.constant 0 : index
    %c0_1 = arith.constant 0 : index
    %3 = vector.load %arg4[%c0, %c0_1] : memref<1x128xf32, #tpu.memory_space<vmem>>, vector<1x128xf32>
    %c0_2 = arith.constant 0 : index
    %c0_3 = arith.constant 0 : index
    %4 = vector.load %arg2[%c0_2, %c0_3] : memref<8x128xf32, #tpu.memory_space<vmem>>, vector<8x128xf32>
    %c0_4 = arith.constant 0 : index
    %c0_5 = arith.constant 0 : index
    %5 = vector.load %arg3[%c0_4, %c0_5] : memref<128x128xf32, #tpu.memory_space<vmem>>, vector<128x128xf32>
    %cst = arith.constant dense<0.000000e+00> : vector<8x128xf32>
    %6 = tpu.matmul %4, %5, %cst {dimension_numbers = #tpu.dot_dimension_numbers<[1], [0], [0], [1], [0, 0, 1, 1], [], []>} : vector<8x128xf32>, vector<128x128xf32>, vector<8x128xf32> -> vector<8x128xf32>
    %7 = vector.broadcast %3 : vector<1x128xf32> to vector<8x128xf32>
    %8 = arith.addf %6, %7 : vector<8x128xf32>
    %cst_6 = arith.constant 0.000000e+00 : f32
    %9 = vector.broadcast %cst_6 : f32 to vector<8x128xf32>
    %10 = arith.maximumf %8, %9 : vector<8x128xf32>
    %c0_7 = arith.constant 0 : index
    %c0_8 = arith.constant 0 : index
    %11 = vector.load %arg8[%c0_7, %c0_8] : memref<8x128xf32, #tpu.memory_space<vmem>>, vector<8x128xf32>
    %c0_9 = arith.constant 0 : index
    %c0_10 = arith.constant 0 : index
    %12 = vector.load %arg5[%c0_9, %c0_10] : memref<128x128xf32, #tpu.memory_space<vmem>>, vector<128x128xf32>
    %cst_11 = arith.constant dense<0.000000e+00> : vector<8x128xf32>
    %13 = tpu.matmul %10, %12, %cst_11 {dimension_numbers = #tpu.dot_dimension_numbers<[1], [0], [0], [1], [0, 0, 1, 1], [], []>} : vector<8x128xf32>, vector<128x128xf32>, vector<8x128xf32> -> vector<8x128xf32>
    %14 = arith.addf %11, %13 : vector<8x128xf32>
    %c0_12 = arith.constant 0 : index
    %c0_13 = arith.constant 0 : index
    %15 = vector.load %arg8[%c0_12, %c0_13] : memref<8x128xf32, #tpu.memory_space<vmem>>, vector<8x128xf32>
    tpu.vector_store %arg8[%c0_12, %c0_13], %14 {strides = array<i32>} : memref<8x128xf32, #tpu.memory_space<vmem>>, vector<8x128xf32>,
    %c0_i32_14 = arith.constant 0 : i32
    %16 = arith.cmpi eq, %arg1, %c0_i32_14 : i32
    %17 = arith.extui %16 : i1 to i32
    %c0_i32_15 = arith.constant 0 : i32
    %18 = arith.cmpi ne, %17, %c0_i32_15 : i32
    scf.if %18 {
      %c0_16 = arith.constant 0 : index
      %c0_17 = arith.constant 0 : index
      %19 = vector.load %arg8[%c0_16, %c0_17] : memref<8x128xf32, #tpu.memory_space<vmem>>, vector<8x128xf32>
      %c0_18 = arith.constant 0 : index
      %c0_19 = arith.constant 0 : index
      %20 = vector.load %arg6[%c0_18, %c0_19] : memref<1x128xf32, #tpu.memory_space<vmem>>, vector<1x128xf32>
      %21 = vector.broadcast %20 : vector<1x128xf32> to vector<8x128xf32>
      %22 = arith.addf %19, %21 : vector<8x128xf32>
      %c0_20 = arith.constant 0 : index
      %c0_21 = arith.constant 0 : index
      %23 = vector.load %arg7[%c0_20, %c0_21] : memref<8x128xf32, #tpu.memory_space<vmem>>, vector<8x128xf32>
      tpu.vector_store %arg7[%c0_20, %c0_21], %22 {strides = array<i32>} : memref<8x128xf32, #tpu.memory_space<vmem>>, vector<8x128xf32>,
    } else {
    }
    return
  }
  func.func @transform_0(%arg0: i32, %arg1: i32) -> (i32, i32) {
    %c0_i32 = arith.constant 0 : i32
    %c0_i32_0 = arith.constant 0 : i32
    return %arg0, %c0_i32 : i32, i32
  }
  func.func @transform_1(%arg0: i32, %arg1: i32) -> (i32, i32) {
    %c0_i32 = arith.constant 0 : i32
    %c0_i32_0 = arith.constant 0 : i32
    return %c0_i32, %arg1 : i32, i32
  }
  func.func @transform_2(%arg0: i32, %arg1: i32) -> (i32, i32) {
    %c0_i32 = arith.constant 0 : i32
    %c0_i32_0 = arith.constant 0 : i32
    %c0_i32_1 = arith.constant 0 : i32
    return %c0_i32, %c0_i32_0 : i32, i32
  }
  func.func @transform_3(%arg0: i32, %arg1: i32) -> (i32, i32) {
    %c0_i32 = arith.constant 0 : i32
    %c0_i32_0 = arith.constant 0 : i32
    return %arg1, %c0_i32 : i32, i32
  }
  func.func @transform_4(%arg0: i32, %arg1: i32) -> (i32, i32) {
    %c0_i32 = arith.constant 0 : i32
    %c0_i32_0 = arith.constant 0 : i32
    %c0_i32_1 = arith.constant 0 : i32
    return %c0_i32, %c0_i32_0 : i32, i32
  }
  func.func @transform_5(%arg0: i32, %arg1: i32) -> (i32, i32) {
    %c0_i32 = arith.constant 0 : i32
    %c0_i32_0 = arith.constant 0 : i32
    return %arg0, %c0_i32 : i32, i32
  }
}

</mosaic_0001>

<bundles_post_ra>
// kernel: feed_forward.1
= control target key start
LH: loop header
LB: loop body
LE: loop exit
PB: predicated region body
PF: predicated region fallthrough
CT: control target
= control target key end

     0   :  { %10 = vsyncpa [#allocation4], 0  ;;  %s985_s0 = inlined_call_operand.vmem [shape: f32[16,128], index: 0, kind: input, shape index: {}]   ;;  %s986_s1 = inlined_call_operand.hbm [shape: f32[128,128], index: 1, kind: input, shape index: {}]   ;;  %s987_s2 = inlined_call_operand.vmem [shape: f32[1,128], index: 2, kind: input, shape index: {}]   ;;  %s988_s3 = inlined_call_operand.hbm [shape: f32[128,128], index: 3, kind: input, shape index: {}]   ;;  %s989_s4 = inlined_call_operand.vmem [shape: f32[1,128], index: 4, kind: input, shape index: {}]   ;;  %s990_s5 = inlined_call_operand.vmem [shape: f32[16,128], index: 5, kind: output, shape index: {}]  }
   0x1   :  { %11 = vsyncpa [#allocation6], 0  ;;  %s856_s18 = smov 0   ;;  %s858_s19 = smov 0  }
   0x2   :  { %s860_s20 = smov 0  }
   0x3 LB: > { %s568_s21 = sadd.s32 4294967295, %s818_s20   ;;  %s29_s22 = sadd.s32 1, %s814_s19  ;;  %s818_s20 = sphi %s860_s20, %s17_s20   ;;  %s814_s19 = sphi %s858_s19, %s995_s19   ;;  %s810_s18 = sphi %s856_s18, %s994_s18  }
   0x4   : > { %p31_p0 = scmp.ge.s32.totalorder %s29_s22, 2  ;;  %p570_p1 = scmp.ge.s32.totalorder %s818_s20, 1 }
   0x5   : > { %p180_p2 = scmp.lt.s32.totalorder %s818_s20, 3  ;;  %p881_p4 = scmp.eq.s32.totalorder %s568_s21, 0 }
   0x6   : > { %s997_s22 = smov (%p31_p0, %s29_s22), 0  ;;  %s820_s25 = smov [#allocation3]  }
   0x7   : > { %p877_p3 = pnand %p570_p1, %p180_p2  ;;  %s194_s26 = sshll.u32 %s820_s25, 4  ;;  %s195_s26 = int_to_ptr.vmem [resolvable:$true] %s194_s26 }
   0x8   : > { %s821_s28 = smov [#allocation5]   ;;  %s747_s30 = scalar_lea.vmem %s195_s26, 2048 }
   0x9   : > { %p695_p5 = pneg %p877_p3  ;;  %s213_s29 = sshll.u32 %s821_s28, 4  ;;  %s214_s29 = int_to_ptr.vmem [resolvable:$true] %s213_s29 }
   0xa   : > { %p748_p8 = scmp.ne.s32.totalorder %s195_s26, %s747_s30  ;;  %p755_p11 = scmp.lt.s32.totalorder %s195_s26, %s195_s26 }
   0xb   : > { %p889_p6 = pnand %p881_p4, %p695_p5  ;;  %p756_p12 = scmp.lt.s32.totalorder %s747_s30, %s747_s30 }
   0xd   : > { %p738_p7 = pneg %p889_p6  ;;  %p757_p13 = por %p756_p12, %p755_p11 }
   0xf   : > { %p750_p9 = pnand %p748_p8, %p738_p7 }
  0x11   : > { %p751_p10 = pneg %p750_p9 }
  0x13   : > { %p758_p0 = pnand %p757_p13, %p751_p10 }
  0x15   : > { %761 = shalt.err (!%p758_p0)
}
  0x16   : > { %s822_s6 = smov 128   ;;  %s823_s7 = smov 8  }
  0x17   : > { %698 = dma.hbm_to_vmem [thread:$0]  (!%p889_p6), %s986_s1, 2048, %s195_s26, [#allocation4], %s822_s6, %s822_s6, %s823_s7  }
  0x18   : > { %s773_s10 = scalar_lea.vmem %s214_s29, 2048  ;;  %p781_p8 = scmp.lt.s32.totalorder %s214_s29, %s214_s29 }
  0x19   : > { %p774_p1 = scmp.ne.s32.totalorder %s214_s29, %s773_s10  ;;  %p782_p9 = scmp.lt.s32.totalorder %s773_s10, %s773_s10 }
  0x1b   : > { %p776_p2 = pnand %p774_p1, %p738_p7  ;;  %p783_p11 = por %p782_p9, %p781_p8 }
  0x1d   : > { %p777_p5 = pneg %p776_p2 }
  0x1f   : > { %p784_p10 = pnand %p783_p11, %p777_p5 }
  0x21   : > { %787 = shalt.err (!%p784_p10)
}
  0x22   : > { %701 = dma.hbm_to_vmem [thread:$0]  (!%p889_p6), %s988_s3, 2048, %s214_s29, [#allocation6], %s822_s6, %s822_s6, %s823_s7  }
  0x23   : > { %239 = sbr.rel (%p877_p3) target bundleno = 470 (0x1d6), region = 40 }
  0x28   : > { %801 = dma.done.wait (%p881_p4), [#allocation4], 2048  }
  0x29   : > { %803 = vsyncadd (%p881_p4), [#allocation4], 4294965248 }
  0x2a   : > { %805 = dma.done.wait (%p881_p4), [#allocation6], 2048  }
  0x2b   : > { %807 = vsyncadd (%p881_p4), [#allocation6], 4294965248  ;;  %v824_v0 = vmov 0.0   ;;  %vm825_vm0 = vmmov 0   ;;  %v300_v1 = vld [vmem:[#allocation3 + $0x78] sm:$0xff]  ;;  %v299_v2 = vld [vmem:[#allocation3 + $0x70] sm:$0xff] }
  0x2c   : > { %617 = vmatprep.subr.mxu0 %v824_v0  ;;  %649 = vmatprep.mubr.msk.f32.mxu0 %vm825_vm0, %v824_v0  ;;  %v298_v3 = vld [vmem:[#allocation3 + $0x68] sm:$0xff]  ;;  %v297_v4 = vld [vmem:[#allocation3 + $0x60] sm:$0xff]  ;;  %v394_v5 = vld [vmem:[#allocation5 + $0x78] sm:$0xff]  ;;  %p269_p3 = scmp.lt.s32.totalorder %s810_s18, 1 }
  0x2d   : > { %652 = vmatprep.subr.mxu1 %v824_v0  ;;  %684 = vmatprep.mubr.msk.f32.mxu1 %vm825_vm0, %v824_v0  ;;  %v296_v6 = vld [vmem:[#allocation3 + $0x58] sm:$0xff]  ;;  %v393_v7 = vld [vmem:[#allocation5 + $0x70] sm:$0xff]  ;;  %v392_v8 = vld [vmem:[#allocation5 + $0x68] sm:$0xff] }
  0x2e   : > { %618 = vmatpush3.msra.mxu0 %v300_v1  ;;  %653 = vmatpush3.msra.mxu1 %v394_v5  ;;  %v295_v9 = vld [vmem:[#allocation3 + $0x50] sm:$0xff]  ;;  %v391_v10 = vld [vmem:[#allocation5 + $0x60] sm:$0xff]  ;;  %v294_v11 = vld [vmem:[#allocation3 + $0x48] sm:$0xff]  ;;  %s999_s18 = smov (!%p269_p3, %s810_s18), 1 }
  0x2f   : > { %619 = vmatprep.subr.mxu0 %v824_v0  ;;  %654 = vmatprep.subr.mxu1 %v824_v0  ;;  %v390_v12 = vld [vmem:[#allocation5 + $0x58] sm:$0xff]  ;;  %v293_v13 = vld [vmem:[#allocation3 + $0x40] sm:$0xff]  ;;  %v389_v14 = vld [vmem:[#allocation5 + $0x50] sm:$0xff]  ;;  %s577_s13 = sshll.u32 %s999_s18, 3 }
  0x30   : > { %620 = vmatpush3.msra.mxu0 %v299_v2  ;;  %655 = vmatpush3.msra.mxu1 %v393_v7  ;;  %v292_v15 = vld [vmem:[#allocation3 + $0x38] sm:$0xff]  ;;  %v388_v16 = vld [vmem:[#allocation5 + $0x48] sm:$0xff]  ;;  %v291_v17 = vld [vmem:[#allocation3 + $0x30] sm:$0xff]  ;;  %s272_s16 = scalar_lea.vmem %s985_s0, %s577_s13  ;;  %s277_s27 = scalar_lea.vmem %s990_s5, %s577_s13 }
  0x31   : > { %621 = vmatprep.subr.mxu0 %v824_v0  ;;  %656 = vmatprep.subr.mxu1 %v824_v0  ;;  %v387_v18 = vld [vmem:[#allocation5 + $0x40] sm:$0xff]  ;;  %v290_v19 = vld [vmem:[#allocation3 + $0x28] sm:$0xff]  ;;  %v386_v20 = vld [vmem:[#allocation5 + $0x38] sm:$0xff] }
  0x32   : > { %622 = vmatpush3.msra.mxu0 %v298_v3  ;;  %657 = vmatpush3.msra.mxu1 %v392_v8  ;;  %v289_v21 = vld [vmem:[#allocation3 + $0x20] sm:$0xff]  ;;  %v385_v22 = vld [vmem:[#allocation5 + $0x30] sm:$0xff]  ;;  %v288_v23 = vld [vmem:[#allocation3 + $0x18] sm:$0xff] }
  0x33   : > { %623 = vmatprep.subr.mxu0 %v824_v0  ;;  %658 = vmatprep.subr.mxu1 %v824_v0  ;;  %v384_v24 = vld [vmem:[#allocation5 + $0x28] sm:$0xff]  ;;  %v287_v25 = vld [vmem:[#allocation3 + $0x10] sm:$0xff]  ;;  %v383_v26 = vld [vmem:[#allocation5 + $0x20] sm:$0xff] }
  0x34   : > { %624 = vmatpush3.msra.mxu0 %v297_v4  ;;  %659 = vmatpush3.msra.mxu1 %v391_v10  ;;  %v286_v27 = vld [vmem:[#allocation3 + $0x8] sm:$0xff]  ;;  %v382_v28 = vld [vmem:[#allocation5 + $0x18] sm:$0xff]  ;;  %v285_v29 = vld [vmem:[#allocation3] sm:$0xff] }
  0x35   : > { %625 = vmatprep.subr.mxu0 %v824_v0  ;;  %660 = vmatprep.subr.mxu1 %v824_v0  ;;  %v284_v30 = vld [vmem:[%s272_s16] sm:$0xff]  ;;  %v381_v31 = vld [vmem:[#allocation5 + $0x10] sm:$0xff]  ;;  %v380_v32 = vld [vmem:[#allocation5 + $0x8] sm:$0xff] }
  0x36   : > { %626 = vmatpush3.msra.mxu0 %v296_v6  ;;  %661 = vmatpush3.msra.mxu1 %v390_v12  ;;  %v379_v33 = vld [vmem:[#allocation5] sm:$0xff] }
  0x37   : > { %627 = vmatprep.subr.mxu0 %v824_v0  ;;  %662 = vmatprep.subr.mxu1 %v824_v0  ;;  %v579_v34 = vld [vmem:[%s987_s2] ss:$0 sm:$0xff] }
  0x38   : > { %628 = vmatpush3.msra.mxu0 %v295_v9  ;;  %663 = vmatpush3.msra.mxu1 %v389_v14  ;;  %v580_v39 = vld [vmem:[%s989_s4] ss:$0 sm:$0xff] }
  0x39   : > { %629 = vmatprep.subr.mxu0 %v824_v0  ;;  %664 = vmatprep.subr.mxu1 %v824_v0 }
  0x3a   : > { %630 = vmatpush3.msra.mxu0 %v294_v11  ;;  %665 = vmatpush3.msra.mxu1 %v388_v16 }
  0x3b   : > { %631 = vmatprep.subr.mxu0 %v824_v0  ;;  %666 = vmatprep.subr.mxu1 %v824_v0 }
  0x3c   : > { %632 = vmatpush3.msra.mxu0 %v293_v13  ;;  %667 = vmatpush3.msra.mxu1 %v387_v18 }
  0x3d   : > { %633 = vmatprep.subr.mxu0 %v824_v0  ;;  %668 = vmatprep.subr.mxu1 %v824_v0 }
  0x3e   : > { %634 = vmatpush3.msra.mxu0 %v292_v15  ;;  %669 = vmatpush3.msra.mxu1 %v386_v20 }
  0x3f   : > { %635 = vmatprep.subr.mxu0 %v824_v0  ;;  %670 = vmatprep.subr.mxu1 %v824_v0 }
  0x40   : > { %636 = vmatpush3.msra.mxu0 %v291_v17  ;;  %671 = vmatpush3.msra.mxu1 %v385_v22 }
  0x41   : > { %637 = vmatprep.subr.mxu0 %v824_v0  ;;  %672 = vmatprep.subr.mxu1 %v824_v0 }
  0x42   : > { %638 = vmatpush3.msra.mxu0 %v290_v19  ;;  %673 = vmatpush3.msra.mxu1 %v384_v24 }
  0x43   : > { %639 = vmatprep.subr.mxu0 %v824_v0  ;;  %674 = vmatprep.subr.mxu1 %v824_v0 }
  0x44   : > { %640 = vmatpush3.msra.mxu0 %v289_v21  ;;  %675 = vmatpush3.msra.mxu1 %v383_v26 }
  0x45   : > { %641 = vmatprep.subr.mxu0 %v824_v0  ;;  %676 = vmatprep.subr.mxu1 %v824_v0 }
  0x46   : > { %642 = vmatpush3.msra.mxu0 %v288_v23  ;;  %677 = vmatpush3.msra.mxu1 %v382_v28 }
  0x47   : > { %643 = vmatprep.subr.mxu0 %v824_v0  ;;  %678 = vmatprep.subr.mxu1 %v824_v0 }
  0x48   : > { %644 = vmatpush3.msra.mxu0 %v287_v25  ;;  %679 = vmatpush3.msra.mxu1 %v381_v31 }
  0x49   : > { %645 = vmatprep.subr.mxu0 %v824_v0  ;;  %680 = vmatprep.subr.mxu1 %v824_v0 }
  0x4a   : > { %646 = vmatpush3.msra.mxu0 %v286_v27  ;;  %681 = vmatpush3.msra.mxu1 %v380_v32 }
  0x4b   : > { %647 = vmatprep.subr.mxu0 %v824_v0  ;;  %682 = vmatprep.subr.mxu1 %v824_v0 }
  0x4c   : > { %648 = vmatpush3.msra.mxu0 %v285_v29  ;;  %683 = vmatpush3.msra.mxu1 %v379_v33 }
  0x4d   : > { %650 = vmatmul.mubr.f32.vlgmr.msra.gmra.mxu0 %v284_v30 }
 0x10d   : > { %v373_v35 = vpop.f32.mrf.mxu0 }
 0x10e   : > { %v374_v36 = vadd.f32 %v579_v34, %v373_v35 }
 0x10f   : > { %v651_v37 = vpop.f32.mrf.mxu0 }
 0x110   : > { %v377_v38 = vmax.f32 %v374_v36, 0.0 }
 0x112   : > { %685 = vmatmul.mubr.f32.vlgmr.msra.gmra.mxu1 %v377_v38 }
 0x1d2   : > { %v461_v40 = vpop.f32.mrf.mxu1 }
 0x1d3   : > { %v478_v41 = vadd.f32 %v580_v39, %v461_v40 }
 0x1d4   : > { %v686_v42 = vpop.f32.mrf.mxu1 }
 0x1d5   : > { %479 = vst [vmem:[%s277_s27] sm:$0xff] %v478_v41 }
 0x1d6 PF: > { %s17_s20 = sadd.s32 1, %s818_s20   ;;  %s994_s18 = smov %s814_s19 }
 0x1d7   : > { %p14_p4 = scmp.ge.s32.totalorder %s17_s20, 4   ;;  %s995_s19 = smov %s997_s22 }
 0x1d9   :  { %16 = sbr.rel (!%p14_p4) target bundleno = 3 (0x3), region = 89 }
 0x1de   :  { %499 = vsyncpa [#allocation4], 1 }
 0x1df   :  { %501 = vsyncpa [#allocation4 + $0x1], 1 }
 0x1e0   :  { %502 = vsyncpa [#allocation6], 1 }

</bundles_post_ra>
